<compile_context>
chip_gen: v6e
topology: v6e:2x2x1
jax: 0.10.0
libtpu: 0.0.40
codegen_flags: <defaults>
</compile_context>

<pallas_src>
import jax
import jax.numpy as jnp
from jax.experimental import pallas as pl
from jax.experimental.pallas import tpu as pltpu


def _round_up(x: int, m: int) -> int:
    return (x + m - 1) // m * m


def _choose_tile_n(Ep: int, N: int, target_bytes: int = 2 * 1024 * 1024) -> int:
    """Logits tile width: ~2 MiB of streamed bf16 table per grid step.

    Multiple of 128 (lane-dense output), capped to [512, 16384], and never
    wider than the (128-rounded) catalog so tiny catalogs aren't over-padded.
    """
    tn = target_bytes // (Ep * 2)          # bf16 columns in the byte budget
    tn = max(512, min(tn, 16384))
    tn = _round_up(tn, 128)
    tn = min(tn, _round_up(N, 128))
    return tn


# ---------------------------------------------------------------------------
# Kernel A: state-encoder forward (masked mean pool -> dense -> tanh)
# ---------------------------------------------------------------------------
def encode_kernel(emb_ref, mask_ref, w_ref, b_ref, dense_ref, dense_bf16_ref):
    # emb_ref:   (Bp, S, Ep) f32  summed item+feedback embeddings
    # mask_ref:  (Bp, S)     f32  1.0 for valid positions (< seq_length)
    # w_ref:     (Ep, Ep)    f32  dense projection
    # b_ref:     (1, Ep)     f32  bias
    # outputs:   f32 dense (returned to caller) + bf16 copy (LHS of kernel B)
    emb = emb_ref[...]
    mask = mask_ref[...]

    num = jnp.sum(emb * mask[:, :, None], axis=1)            # (Bp, Ep)
    den = jnp.sum(mask, axis=1, keepdims=True)                # (Bp, 1)
    # Clamp: zero-length (padded) rows would otherwise divide by zero; the
    # reference would produce NaN -- here they give pooled = 0 (intentional).
    inv = pl.reciprocal(jnp.maximum(den, 1.0), approx=False)
    pooled = num * inv

    dense = jnp.tanh(
        jnp.dot(pooled, w_ref[...], preferred_element_type=jnp.float32)
        + b_ref[...]
    )
    dense_ref[...] = dense
    dense_bf16_ref[...] = dense.astype(jnp.bfloat16)


# ---------------------------------------------------------------------------
# Kernel B: compute_logits = dense @ item_embedding.T, tiled over the catalog
# ---------------------------------------------------------------------------
def logits_kernel(dense_ref, itemw_t_ref, logits_ref):
    # dense_ref:   (Bp, Ep) bf16  resident across all N tiles (constant block)
    # itemw_t_ref: (Ep, TN) bf16  one streamed tile of the transposed table
    # logits_ref:  (Bp, TN) f32   lane-dense output tile
    logits_ref[...] = jnp.dot(
        dense_ref[...], itemw_t_ref[...], preferred_element_type=jnp.float32
    )


# ---------------------------------------------------------------------------
# One-time parameter prep (hoisted off the per-call hot path)
# ---------------------------------------------------------------------------
def prepare_policy_params(params):
    item_emb = params["item_embedding"].astype(jnp.float32)     # (N, E)
    fb_emb = params["feedback_embedding"].astype(jnp.float32)   # (F, E)
    W = params["W"].astype(jnp.float32)                         # (E, E)
    b = params["b"].astype(jnp.float32)                         # (E,)

    N, E = item_emb.shape
    Ep = _round_up(E, 16)          # bf16 sublane packing only -- NOT 128
    TN = _choose_tile_n(Ep, N)
    Np = _round_up(N, TN)          # pad catalog up to a multiple of TN

    # Pre-transposed bf16 table: (Ep, Np) streams straight into the MXU with
    # no per-tile XLU transpose and half the HBM bytes of f32.  Done ONCE.
    itemw_t = jnp.pad(item_emb, ((0, Np - N), (0, Ep - E))).T.astype(jnp.bfloat16)

    W_p = jnp.pad(W, ((0, Ep - E), (0, Ep - E)))
    b_p = jnp.pad(b, (0, Ep - E)).reshape(1, Ep)

    return {
        "item_embedding": item_emb,        # unpadded, for gathers
        "feedback_embedding": fb_emb,      # unpadded, for gathers
        "itemw_t": itemw_t,                # (Ep, Np) bf16, cached
        "W_p": W_p,
        "b_p": b_p,
        "N": N, "E": E, "Ep": Ep, "Np": Np, "TN": TN,
    }


# ---------------------------------------------------------------------------
# Forward: actor(seq_items, seq_feedbacks, seq_length) + compute_logits
# ---------------------------------------------------------------------------
def base_policy_forward(seq_items, seq_feedbacks, seq_length, prepared):
    item_emb = prepared["item_embedding"]
    fb_emb = prepared["feedback_embedding"]
    itemw_t = prepared["itemw_t"]
    W_p, b_p = prepared["W_p"], prepared["b_p"]
    N, E, Ep, Np, TN = (prepared[k] for k in ("N", "E", "Ep", "Np", "TN"))
    num_tiles = Np // TN

    B, S = seq_items.shape
    Bp = _round_up(B, 8)

    # Gather from the UNPADDED tables (small (B,S,E) result), then pad that.
    # TODO(synk): move the gather in-kernel via scalar prefetch once B*S*E is
    # comparable to the (N, E) table traffic.
    emb_seq = item_emb[seq_items] + fb_emb[seq_feedbacks]            # (B, S, E)
    emb_seq_p = jnp.pad(emb_seq, ((0, Bp - B), (0, 0), (0, Ep - E)))
    mask = (jnp.arange(S)[None, :] < seq_length[:, None]).astype(jnp.float32)
    mask_p = jnp.pad(mask, ((0, Bp - B), (0, 0)))

    vmem_limit = 32 * 1024 * 1024  # safe on v5e/v6e/v7x; tiles well under it

    # ---- Kernel A: encoder (KB-scale, single block) ------------------------
    dense_f32, dense_bf16 = pl.pallas_call(
        encode_kernel,
        out_shape=(
            jax.ShapeDtypeStruct((Bp, Ep), jnp.float32),
            jax.ShapeDtypeStruct((Bp, Ep), jnp.bfloat16),
        ),
        grid=(1,),
        in_specs=[
            pl.BlockSpec((Bp, S, Ep), lambda i: (0, 0, 0)),
            pl.BlockSpec((Bp, S), lambda i: (0, 0)),
            pl.BlockSpec((Ep, Ep), lambda i: (0, 0)),
            pl.BlockSpec((1, Ep), lambda i: (0, 0)),
        ],
        out_specs=(
            pl.BlockSpec((Bp, Ep), lambda i: (0, 0)),
            pl.BlockSpec((Bp, Ep), lambda i: (0, 0)),
        ),
        compiler_params=pltpu.CompilerParams(
            dimension_semantics=("arbitrary",),
            vmem_limit_bytes=vmem_limit,
        ),
    )(emb_seq_p, mask_p, W_p, b_p)

    # ---- Kernel B: logits = dense @ item_table.T (HBM-bound stream) --------
    logits_p = pl.pallas_call(
        logits_kernel,
        out_shape=jax.ShapeDtypeStruct((Bp, Np), jnp.float32),
        grid=(num_tiles,),
        in_specs=[
            pl.BlockSpec((Bp, Ep), lambda j: (0, 0)),   # resident bf16 LHS
            pl.BlockSpec((Ep, TN), lambda j: (0, j)),   # streamed, double-buffered
        ],
        out_specs=pl.BlockSpec((Bp, TN), lambda j: (0, j)),   # lane-dense tile
        compiler_params=pltpu.CompilerParams(
            dimension_semantics=("parallel",),          # megacore shard of N (v7x)
            vmem_limit_bytes=vmem_limit,
        ),
        cost_estimate=pl.CostEstimate(
            flops=2 * Bp * Ep * Np,
            transcendentals=0,
            bytes_accessed=Ep * Np * 2 + Bp * Np * 4 + Bp * Ep * 2,
        ),
    )(dense_bf16, itemw_t)

    dense = dense_f32[:B, :E]
    logits = logits_p[:B, :N]
    return dense, logits


def reference_forward(seq_items, seq_feedbacks, seq_length, params):
    """Pure-JAX f32 reference for correctness checking."""
    item_emb = params["item_embedding"]
    fb_emb = params["feedback_embedding"]
    W, b = params["W"], params["b"]
    S = seq_items.shape[1]
    emb_seq = item_emb[seq_items] + fb_emb[seq_feedbacks]
    mask = (jnp.arange(S)[None, :] < seq_length[:, None]).astype(jnp.float32)
    pooled = (emb_seq * mask[:, :, None]).sum(1) / mask.sum(1, keepdims=True)
    dense = jnp.tanh(pooled @ W + b)
    logits = dense @ item_emb.T
    return dense, logits


# TODO(synk): act / get_next_tuple / soft_update / frozen_target_grads are
# training bookkeeping (in-place sequence edits, parameter EMA, requires_grad
# toggles) with no kernel compute -- not translated.

if __name__ == "__main__":
    key = jax.random.PRNGKey(0)
    k1, k2, k3, k4, k5, k6 = jax.random.split(key, 6)

    B, S, E, N, F = 2, 8, 32, 64, 3  # batch, seq, item_embed_size, n_items, n_feedbacks

    params = {
        "item_embedding": jax.random.normal(k1, (N, E), jnp.float32) * 0.1,
        "feedback_embedding": jax.random.normal(k2, (F, E), jnp.float32) * 0.1,
        "W": jax.random.normal(k3, (E, E), jnp.float32) * 0.1,
        "b": jax.random.normal(k4, (E,), jnp.float32) * 0.01,
    }

    # One-time param prep (pad + transpose + bf16 cast of the item table),
    # hoisted off the per-call path and reused across forwards.
    prepared = prepare_policy_params(params)

    seq_items = jax.random.randint(k5, (B, S), 0, N, dtype=jnp.int32)
    seq_feedbacks = jax.random.randint(k6, (B, S), 0, F, dtype=jnp.int32)
    seq_length = jnp.array([5, 8], dtype=jnp.int32)

    dense, logits = base_policy_forward(seq_items, seq_feedbacks, seq_length, prepared)
    jax.block_until_ready((dense, logits))

    dense_r, logits_r = reference_forward(seq_items, seq_feedbacks, seq_length, params)
    assert dense.shape == (B, E) and logits.shape == (B, N)
    # dense path is pure f32 -> tight tolerance
    assert jnp.allclose(dense, dense_r, atol=1e-5, rtol=1e-5)
    # item table + dense LHS streamed as bf16 (bandwidth optimization) -> bf16-level tolerance
    assert jnp.allclose(logits, logits_r, atol=5e-3, rtol=5e-2)

    print("KERNEL_OK")
</pallas_src>

<mosaic_0001>
module attributes {stable_mosaic.version = 11 : i64} {
  func.func @encode_kernel(%arg0: i32, %arg1: memref<8x8x32xf32, #tpu.memory_space<vmem>>, %arg2: memref<8x8xf32, #tpu.memory_space<vmem>>, %arg3: memref<32x32xf32, #tpu.memory_space<vmem>>, %arg4: memref<1x32xf32, #tpu.memory_space<vmem>>, %arg5: memref<8x32xf32, #tpu.memory_space<vmem>>, %arg6: memref<8x32xbf16, #tpu.memory_space<vmem>>) attributes {dimension_semantics = [#tpu.dimension_semantics<arbitrary>], iteration_bounds = array<i64: 1>, scalar_prefetch = 0 : i64, scratch_operands = 0 : i64, tpu.core_type = #tpu.core_type<tc>, window_params = [{pipeline_mode = #tpu.pipeline_mode<synchronous>, transform_indices = @transform_0, window_bounds = array<i64: 8, 8, 32>}, {pipeline_mode = #tpu.pipeline_mode<synchronous>, transform_indices = @transform_1, window_bounds = array<i64: 8, 8>}, {pipeline_mode = #tpu.pipeline_mode<synchronous>, transform_indices = @transform_2, window_bounds = array<i64: 32, 32>}, {pipeline_mode = #tpu.pipeline_mode<synchronous>, transform_indices = @transform_3, window_bounds = array<i64: 1, 32>}, {pipeline_mode = #tpu.pipeline_mode<synchronous>, transform_indices = @transform_4, window_bounds = array<i64: 8, 32>}, {pipeline_mode = #tpu.pipeline_mode<synchronous>, transform_indices = @transform_5, window_bounds = array<i64: 8, 32>}]} {
    %c0 = arith.constant 0 : index
    %c0_0 = arith.constant 0 : index
    %c0_1 = arith.constant 0 : index
    %0 = vector.load %arg1[%c0, %c0_0, %c0_1] : memref<8x8x32xf32, #tpu.memory_space<vmem>>, vector<8x8x32xf32>
    %c0_2 = arith.constant 0 : index
    %c0_3 = arith.constant 0 : index
    %1 = vector.load %arg2[%c0_2, %c0_3] : memref<8x8xf32, #tpu.memory_space<vmem>>, vector<8x8xf32>
    %2 = vector.shape_cast %1 : vector<8x8xf32> to vector<8x8x1xf32>
    %3 = vector.broadcast %2 : vector<8x8x1xf32> to vector<8x8x32xf32>
    %4 = arith.mulf %0, %3 : vector<8x8x32xf32>
    %cst = arith.constant dense<0.000000e+00> : vector<8x32xf32>
    %5 = vector.multi_reduction <add>, %4, %cst [1] : vector<8x8x32xf32> to vector<8x32xf32>
    %cst_4 = arith.constant dense<0.000000e+00> : vector<8xf32>
    %6 = vector.multi_reduction <add>, %1, %cst_4 [1] : vector<8x8xf32> to vector<8xf32>
    %7 = vector.shape_cast %6 : vector<8xf32> to vector<8x1xf32>
    %cst_5 = arith.constant 1.000000e+00 : f32
    %8 = vector.broadcast %cst_5 : f32 to vector<8x1xf32>
    %9 = arith.maximumf %7, %8 : vector<8x1xf32>
    %10 = tpu.reciprocal %9 : vector<8x1xf32> -> vector<8x1xf32>
    %11 = vector.broadcast %10 : vector<8x1xf32> to vector<8x32xf32>
    %12 = arith.mulf %5, %11 : vector<8x32xf32>
    %c0_6 = arith.constant 0 : index
    %c0_7 = arith.constant 0 : index
    %13 = vector.load %arg3[%c0_6, %c0_7] : memref<32x32xf32, #tpu.memory_space<vmem>>, vector<32x32xf32>
    %cst_8 = arith.constant dense<0.000000e+00> : vector<8x32xf32>
    %14 = tpu.matmul %12, %13, %cst_8 {dimension_numbers = #tpu.dot_dimension_numbers<[1], [0], [0], [1], [0, 0, 1, 1], [], []>} : vector<8x32xf32>, vector<32x32xf32>, vector<8x32xf32> -> vector<8x32xf32>
    %c0_9 = arith.constant 0 : index
    %c0_10 = arith.constant 0 : index
    %15 = vector.load %arg4[%c0_9, %c0_10] : memref<1x32xf32, #tpu.memory_space<vmem>>, vector<1x32xf32>
    %16 = vector.broadcast %15 : vector<1x32xf32> to vector<8x32xf32>
    %17 = arith.addf %14, %16 : vector<8x32xf32>
    %18 = math.tanh %17 : vector<8x32xf32>
    %c0_11 = arith.constant 0 : index
    %c0_12 = arith.constant 0 : index
    %19 = vector.load %arg5[%c0_11, %c0_12] : memref<8x32xf32, #tpu.memory_space<vmem>>, vector<8x32xf32>
    tpu.vector_store %arg5[%c0_11, %c0_12], %18 {strides = array<i32>} : memref<8x32xf32, #tpu.memory_space<vmem>>, vector<8x32xf32>,
    %20 = arith.truncf %18 : vector<8x32xf32> to vector<8x32xbf16>
    %c0_13 = arith.constant 0 : index
    %c0_14 = arith.constant 0 : index
    %21 = vector.load %arg6[%c0_13, %c0_14] : memref<8x32xbf16, #tpu.memory_space<vmem>>, vector<8x32xbf16>
    tpu.vector_store %arg6[%c0_13, %c0_14], %20 {strides = array<i32>} : memref<8x32xbf16, #tpu.memory_space<vmem>>, vector<8x32xbf16>,
    return
  }
  func.func @transform_0(%arg0: i32) -> (i32, i32, i32) {
    %c0_i32 = arith.constant 0 : i32
    %c0_i32_0 = arith.constant 0 : i32
    %c0_i32_1 = arith.constant 0 : i32
    %c0_i32_2 = arith.constant 0 : i32
    return %c0_i32, %c0_i32_0, %c0_i32_1 : i32, i32, i32
  }
  func.func @transform_1(%arg0: i32) -> (i32, i32) {
    %c0_i32 = arith.constant 0 : i32
    %c0_i32_0 = arith.constant 0 : i32
    %c0_i32_1 = arith.constant 0 : i32
    return %c0_i32, %c0_i32_0 : i32, i32
  }
  func.func @transform_2(%arg0: i32) -> (i32, i32) {
    %c0_i32 = arith.constant 0 : i32
    %c0_i32_0 = arith.constant 0 : i32
    %c0_i32_1 = arith.constant 0 : i32
    return %c0_i32, %c0_i32_0 : i32, i32
  }
  func.func @transform_3(%arg0: i32) -> (i32, i32) {
    %c0_i32 = arith.constant 0 : i32
    %c0_i32_0 = arith.constant 0 : i32
    %c0_i32_1 = arith.constant 0 : i32
    return %c0_i32, %c0_i32_0 : i32, i32
  }
  func.func @transform_4(%arg0: i32) -> (i32, i32) {
    %c0_i32 = arith.constant 0 : i32
    %c0_i32_0 = arith.constant 0 : i32
    %c0_i32_1 = arith.constant 0 : i32
    return %c0_i32, %c0_i32_0 : i32, i32
  }
  func.func @transform_5(%arg0: i32) -> (i32, i32) {
    %c0_i32 = arith.constant 0 : i32
    %c0_i32_0 = arith.constant 0 : i32
    %c0_i32_1 = arith.constant 0 : i32
    return %c0_i32, %c0_i32_0 : i32, i32
  }
}

</mosaic_0001>

<bundles_post_ra>
// kernel: tpu_custom_call.1
= control target key start
LH: loop header
LB: loop body
LE: loop exit
PB: predicated region body
PF: predicated region fallthrough
CT: control target
= control target key end

     0   :  { %11 = vsyncpa [#allocation3], 0  ;;  %s573_s0 = inlined_call_operand.hbm [shape: f32[8,8,32], index: 0, kind: input, shape index: {}]   ;;  %s574_s1 = inlined_call_operand.hbm [shape: f32[8,8], index: 1, kind: input, shape index: {}]   ;;  %s575_s2 = inlined_call_operand.hbm [shape: f32[32,32], index: 2, kind: input, shape index: {}]   ;;  %s576_s3 = inlined_call_operand.vmem [shape: f32[1,32], index: 3, kind: input, shape index: {}]   ;;  %s577_s4 = inlined_call_operand.hbm [shape: f32[8,32], index: 4, kind: output, shape index: {0}]   ;;  %s578_s5 = inlined_call_operand.hbm [shape: bf16[8,32], index: 5, kind: output, shape index: {1}]  }
   0x1   :  { %12 = vsyncpa [#allocation6], 0 }
   0x2   :  { %13 = vsyncpa [#allocation4], 0 }
   0x3   :  { %14 = vsyncpa [#allocation10], 0  ;;  %s506_s18 = smov [#allocation5]   ;;  %s507_s20 = smov [#allocation2]  }
   0x4   :  { %s33_s19 = sshll.u32 %s506_s18, 4  ;;  %s20_s21 = sshll.u32 %s507_s20, 4  ;;  %s34_s19 = int_to_ptr.vmem [resolvable:$true] %s33_s19  ;;  %s21_s21 = int_to_ptr.vmem [resolvable:$true] %s20_s21 }
   0x5   :  { %s406_s22 = scalar_lea.vmem %s34_s19, 128  ;;  %p411_p1 = scmp.lt.s32.totalorder %s34_s19, %s34_s19 }
   0x6   :  { %p407_p0 = scmp.ne.s32.totalorder %s34_s19, %s406_s22  ;;  %p412_p2 = scmp.lt.s32.totalorder %s406_s22, %s406_s22 }
   0x8   :  { %p413_p3 = por %p412_p2, %p411_p1 }
   0xa   :  { %p414_p4 = pnand %p413_p3, %p407_p0 }
   0xc   :  { %417 = shalt.err (!%p414_p4)
}
   0xd   :  { %36 = dma.hbm_to_vmem [thread:$0]  %s574_s1, 128, %s34_s19, [#allocation6]  }
   0xe   :  { %s426_s25 = scalar_lea.vmem %s21_s21, 1024  ;;  %p431_p6 = scmp.lt.s32.totalorder %s21_s21, %s21_s21 }
   0xf   :  { %p427_p5 = scmp.ne.s32.totalorder %s21_s21, %s426_s25  ;;  %p432_p7 = scmp.lt.s32.totalorder %s426_s25, %s426_s25 }
  0x11   :  { %p433_p8 = por %p432_p7, %p431_p6 }
  0x13   :  { %p434_p9 = pnand %p433_p8, %p427_p5 }
  0x15   :  { %437 = shalt.err (!%p434_p9)
}
  0x16   :  { %s508_s26 = smov 128   ;;  %s509_s27 = smov 8  }
  0x17   :  { %26 = dma.hbm_to_vmem [thread:$0]  %s573_s0, 1024, %s21_s21, [#allocation3], %s508_s26, %s508_s26, %s509_s27  }
  0x18   :  { %s510_s30 = smov [#allocation7]  }
  0x19   :  { %s42_s6 = sshll.u32 %s510_s30, 4  ;;  %s43_s6 = int_to_ptr.vmem [resolvable:$true] %s42_s6 }
  0x1a   :  { %s446_s7 = scalar_lea.vmem %s43_s6, 512  ;;  %p451_p11 = scmp.lt.s32.totalorder %s43_s6, %s43_s6 }
  0x1b   :  { %p447_p10 = scmp.ne.s32.totalorder %s43_s6, %s446_s7  ;;  %p452_p12 = scmp.lt.s32.totalorder %s446_s7, %s446_s7 }
  0x1d   :  { %p453_p13 = por %p452_p12, %p451_p11 }
  0x1f   :  { %p454_p0 = pnand %p453_p13, %p447_p10 }
  0x21   :  { %457 = shalt.err (!%p454_p0)
}
  0x22   :  { %48 = dma.hbm_to_vmem [thread:$0]  %s575_s2, 512, %s43_s6, [#allocation6], %s508_s26, %s508_s26, %s509_s27  }
  0x23   :  { %498 = dma.done.wait [#allocation3], 1024  }
  0x24   :  { %499 = vsyncadd [#allocation3], 4294966272 }
  0x25   :  { %500 = dma.done.wait [#allocation6], 640  }
  0x26   :  { %501 = vsyncadd [#allocation6], 4294966656  ;;  %v69_v0 = vlaneseq  ;;  %vm190_vm0 = vcmask 64512   ;;  %v68_v4 = vld [vmem:[#allocation5] sm:$0xff]  ;;  %v511_v20 = vmov 0.0   ;;  %v222_v22 = vld [vmem:[#allocation7 + $0x10] sm:$0xff] }
  0x27   :  { %v191_v5 = vsel %vm190_vm0, %v68_v4, 0.0  ;;  %374 = vmatprep.subr.mxu0 %v511_v20  ;;  %v223_v21 = vld [vmem:[#allocation7 + $0x18] sm:$0xff]  ;;  %v221_v23 = vld [vmem:[#allocation7 + $0x8] sm:$0xff]  ;;  %vm512_vm1 = vmmov 0   ;;  %v220_v24 = vld [vmem:[#allocation7] sm:$0xff]  ;;  %vm133_vm2 = vcmask 261120  }
  0x28   :  { %v70_v1 = vshrl.u32 %v69_v0, 7  ;;  %192 = vadd.xlane.f32.xlu0 %v191_v5  ;;  %375 = vmatpush3.msra.mxu0 %v223_v21  ;;  %v62_v27 = vld [vmem:[#allocation2 + $0x10] sm:$0xff]  ;;  %v60_v28 = vld [vmem:[#allocation2] sm:$0xff]  ;;  %v63_v30 = vld [vmem:[#allocation2 + $0x18] sm:$0xff]  ;;  %vm240_vm3 = vcmask 1041409   ;;  %vm243_vm4 = vcmask 1042434  }
  0x29   :  { %376 = vmatprep.subr.mxu0 %v511_v20  ;;  %382 = vmatprep.mubr.msk.f32.mxu0 %vm512_vm1, %v511_v20  ;;  %v64_v33 = vld [vmem:[#allocation2 + $0x20] sm:$0xff]  ;;  %v65_v37 = vld [vmem:[#allocation2 + $0x28] sm:$0xff]  ;;  %v66_v46 = vld [vmem:[#allocation2 + $0x30] sm:$0xff]  ;;  %vm246_vm5 = vcmask 1043459   ;;  %vm249_vm6 = vcmask 1044484   ;;  %vm252_vm7 = vcmask 1045509  }
  0x2a   :  { %v85_v2 = vsub.s32 2, %v70_v1  ;;  %v71_v3 = vsub.s32 0, %v70_v1  ;;  %v92_v8 = vsub.s32 3, %v70_v1  ;;  %v99_v10 = vsub.s32 4, %v70_v1  ;;  %377 = vmatpush3.msra.mxu0 %v222_v22  ;;  %v67_v56 = vld [vmem:[#allocation2 + $0x38] sm:$0xff]  ;;  %v61_v62 = vld [vmem:[#allocation2 + $0x8] sm:$0xff] }
  0x2b   :  { %v106_v12 = vsub.s32 5, %v70_v1  ;;  %v113_v14 = vsub.s32 6, %v70_v1  ;;  %v78_v15 = vsub.s32 1, %v70_v1  ;;  %v120_v17 = vsub.s32 7, %v70_v1  ;;  %378 = vmatprep.subr.mxu0 %v511_v20  ;;  %s513_s9 = smov [#allocation8]   ;;  %s514_s11 = smov [#allocation9]  }
  0x2c   :  { %v86_v6 = vrot.slane %v68_v4, %v85_v2  ;;  %v72_v7 = vrot.slane %v68_v4, %v71_v3  ;;  %v93_v9 = vrot.slane %v68_v4, %v92_v8  ;;  %v100_v11 = vrot.slane %v68_v4, %v99_v10  ;;  %379 = vmatpush3.msra.mxu0 %v221_v23  ;;  %s343_s10 = sshll.u32 %s513_s9, 4  ;;  %s353_s12 = sshll.u32 %s514_s11, 4  ;;  %s344_s10 = int_to_ptr.vmem [resolvable:$true] %s343_s10  ;;  %s354_s12 = int_to_ptr.vmem [resolvable:$true] %s353_s12 }
  0x2d   :  { %v107_v13 = vrot.slane %v68_v4, %v106_v12  ;;  %v114_v16 = vrot.slane %v68_v4, %v113_v14  ;;  %v79_v18 = vrot.slane %v68_v4, %v78_v15  ;;  %v121_v19 = vrot.slane %v68_v4, %v120_v17  ;;  %380 = vmatprep.subr.mxu0 %v511_v20  ;;  %s458_s13 = scalar_lea.vmem %s344_s10, 128  ;;  %p463_p2 = scmp.lt.s32.totalorder %s344_s10, %s344_s10 }
  0x2e   :  { %88 = vbcast.lane.b32.xlu1 %v86_v6, 256  ;;  %381 = vmatpush3.msra.mxu0 %v220_v24  ;;  %vm255_vm8 = vcmask 1046534   ;;  %vm258_vm9 = vcmask 1047559   ;;  %vm335_vm10 = vcmask 257024   ;;  %p459_p1 = scmp.ne.s32.totalorder %s344_s10, %s458_s13  ;;  %p464_p3 = scmp.lt.s32.totalorder %s458_s13, %s458_s13 }
  0x30   :  { %p465_p4 = por %p464_p3, %p463_p2 }
  0x32   :  { %74 = vbcast.lane.b32.xlu1 %v72_v7, 256  ;;  %p466_p5 = pnand %p465_p4, %p459_p1 }
  0x36   :  { %95 = vbcast.lane.b32.xlu1 %v93_v9, 256 }
  0x3a   :  { %102 = vbcast.lane.b32.xlu1 %v100_v11, 256 }
  0x3e   :  { %109 = vbcast.lane.b32.xlu1 %v107_v13, 256  ;;  %81 = vbcast.lane.b32.xlu0 %v79_v18, 256 }
  0x42   :  { %116 = vbcast.lane.b32.xlu1 %v114_v16, 256 }
  0x46   :  { %123 = vbcast.lane.b32.xlu1 %v121_v19, 256 }
  0xa0   :  { %v89_v25 = vpop.permute.xlu1 %88 }
  0xa1   :  { %v127_v31 = vmul.f32 %v89_v25, %v62_v27 }
  0xa3   :  { %v148_v38 = vsel %vm133_vm2, %v127_v31, 0.0 }
  0xa4   :  { %v75_v26 = vpop.permute.xlu1 %74  ;;  %v149_v43 = vrot.slane %v148_v38, 4 }
  0xa5   :  { %v125_v32 = vmul.f32 %v75_v26, %v60_v28 }
  0xa6   :  { %v150_v53 = vadd.f32 %v149_v43, %v148_v38 }
  0xa7   :  { %v134_v39 = vsel %vm133_vm2, %v125_v32, 0.0 }
  0xa8   :  { %v96_v29 = vpop.permute.xlu1 %95  ;;  %v135_v44 = vrot.slane %v134_v39, 4  ;;  %v151_v2 = vrot.slane %v150_v53, 2 }
  0xa9   :  { %v128_v35 = vmul.f32 %v96_v29, %v63_v30 }
  0xaa   :  { %v136_v54 = vadd.f32 %v135_v44, %v134_v39  ;;  %v152_v13 = vadd.f32 %v151_v2, %v150_v53 }
  0xab   :  { %v155_v41 = vsel %vm133_vm2, %v128_v35, 0.0 }
  0xac   :  { %v103_v34 = vpop.permute.xlu1 %102  ;;  %v156_v48 = vrot.slane %v155_v41, 4  ;;  %v137_v3 = vrot.slane %v136_v54, 2  ;;  %v153_v23 = vrot.slane %v152_v13, 1 }
  0xad   :  { %v129_v36 = vmul.f32 %v103_v34, %v64_v33 }
  0xae   :  { %v157_v59 = vadd.f32 %v156_v48, %v155_v41  ;;  %v138_v14 = vadd.f32 %v137_v3, %v136_v54  ;;  %v154_v33 = vadd.f32 %v153_v23, %v152_v13 }
  0xaf   :  { %v162_v45 = vsel %vm133_vm2, %v129_v36, 0.0 }
  0xb0   :  { %v110_v40 = vpop.permute.xlu1 %109  ;;  %v163_v50 = vrot.slane %v162_v45, 4  ;;  %v158_v8 = vrot.slane %v157_v59, 2  ;;  %v139_v24 = vrot.slane %v138_v14, 1 }
  0xb1   :  { %v130_v42 = vmul.f32 %v110_v40, %v65_v37  ;;  %v193_v55 = vpop.xlane.xlu0 %192 }
  0xb2   :  { %v194_v58 = vmax.f32 %v193_v55, 1.0  ;;  %v164_v63 = vadd.f32 %v163_v50, %v162_v45  ;;  %v159_v18 = vadd.f32 %v158_v8, %v157_v59  ;;  %v140_v34 = vadd.f32 %v139_v24, %v138_v14 }
  0xb3   :  { %v169_v47 = vsel %vm133_vm2, %v130_v42, 0.0 }
  0xb4   :  { %v117_v49 = vpop.permute.xlu1 %116  ;;  %v170_v51 = vrot.slane %v169_v47, 4  ;;  %394 = vrcp.f32 %v194_v58  ;;  %v165_v10 = vrot.slane %v164_v63, 2  ;;  %v160_v28 = vrot.slane %v159_v18, 1 }
  0xb5   :  { %v131_v52 = vmul.f32 %v117_v49, %v66_v46  ;;  %v82_v4 = vpop.permute.xlu0 %81 }
  0xb6   :  { %v171_v0 = vadd.f32 %v170_v51, %v169_v47  ;;  %v126_v7 = vmul.f32 %v82_v4, %v61_v62  ;;  %v166_v21 = vadd.f32 %v165_v10, %v164_v63  ;;  %v161_v41 = vadd.f32 %v160_v28, %v159_v18 }
  0xb7   :  { %v176_v57 = vsel %vm133_vm2, %v131_v52, 0.0 }
  0xb8   :  { %v177_v60 = vrot.slane %v176_v57, 4  ;;  %v124_v61 = vpop.permute.xlu1 %123  ;;  %v172_v11 = vrot.slane %v171_v0, 2  ;;  %v141_v12 = vsel %vm133_vm2, %v126_v7, 0.0  ;;  %v167_v30 = vrot.slane %v166_v21, 1 }
  0xb9   :  { %v132_v1 = vmul.f32 %v124_v61, %v67_v56  ;;  %v142_v16 = vrot.slane %v141_v12, 4 }
  0xba   :  { %v178_v5 = vadd.f32 %v177_v60, %v176_v57  ;;  %v173_v22 = vadd.f32 %v172_v11, %v171_v0  ;;  %v168_v45 = vadd.f32 %v167_v30, %v166_v21 }
  0xbb   :  { %v183_v6 = vsel %vm133_vm2, %v132_v1, 0.0  ;;  %v143_v20 = vadd.f32 %v142_v16, %v141_v12 }
  0xbc   :  { %v184_v9 = vrot.slane %v183_v6, 4  ;;  %v179_v17 = vrot.slane %v178_v5, 2  ;;  %v174_v31 = vrot.slane %v173_v22, 1 }
  0xbd   :  { %v144_v26 = vrot.slane %v143_v20, 2 }
  0xbe   :  { %v185_v15 = vadd.f32 %v184_v9, %v183_v6  ;;  %v180_v27 = vadd.f32 %v179_v17, %v178_v5  ;;  %v175_v46 = vadd.f32 %v174_v31, %v173_v22  ;;  %v367_v9 = vld [vmem:[%s576_s3] ss:$0 sm:$0xff] }
  0xbf   :  { %v145_v29 = vadd.f32 %v144_v26, %v143_v20 }
  0xc0   :  { %v186_v19 = vrot.slane %v185_v15, 2  ;;  %v181_v37 = vrot.slane %v180_v27, 1 }
  0xc1   :  { %v395_v32 = vpop.eup %394  ;;  %v146_v36 = vrot.slane %v145_v29, 1 }
  0xc2   :  { %v187_v25 = vadd.f32 %v186_v19, %v185_v15  ;;  %v197_v38 = vrot.slane %v395_v32, 1  ;;  %v198_v39 = vrot.slane %v395_v32, 2  ;;  %v199_v40 = vrot.slane %v395_v32, 3 }
  0xc3   :  { %v147_v42 = vadd.f32 %v146_v36, %v145_v29  ;;  %v200_v43 = vrot.slane %v395_v32, 4  ;;  %v201_v44 = vrot.slane %v395_v32, 5  ;;  %v202_v47 = vrot.slane %v395_v32, 6 }
  0xc4   :  { %v188_v35 = vrot.slane %v187_v25, 1  ;;  %v214_v48 = vmul.f32 %v198_v39, %v154_v33  ;;  %v203_v51 = vrot.slane %v395_v32, 7  ;;  %v215_v52 = vmul.f32 %v199_v40, %v161_v41 }
  0xc5   :  { %v213_v50 = vmul.f32 %v197_v38, %v147_v42  ;;  %v182_v53 = vadd.f32 %v181_v37, %v180_v27  ;;  %v216_v54 = vmul.f32 %v200_v43, %v168_v45  ;;  %v212_v55 = vmul.f32 %v395_v32, %v140_v34 }
  0xc6   :  { %v189_v49 = vadd.f32 %v188_v35, %v187_v25  ;;  %v217_v57 = vmul.f32 %v201_v44, %v175_v46  ;;  %v242_v59 = vrot.slane %v214_v48, 6  ;;  %v245_v62 = vrot.slane %v215_v52, 5 }
  0xc7   :  { %v239_v56 = vrot.slane %v213_v50, 7  ;;  %v218_v58 = vmul.f32 %v202_v47, %v182_v53  ;;  %v248_v0 = vrot.slane %v216_v54, 4 }
  0xc8   :  { %v219_v61 = vmul.f32 %v203_v51, %v189_v49  ;;  %v251_v2 = vrot.slane %v217_v57, 3 }
  0xc9   :  { %v241_v60 = vsel %vm240_vm3, %v239_v56, %v212_v55  ;;  %v254_v4 = vrot.slane %v218_v58, 2 }
  0xca   :  { %v244_v63 = vsel %vm243_vm4, %v242_v59, %v241_v60  ;;  %v257_v6 = vrot.slane %v219_v61, 1 }
  0xcb   :  { %v247_v1 = vsel %vm246_vm5, %v245_v62, %v244_v63 }
  0xcc   :  { %v250_v3 = vsel %vm249_vm6, %v248_v0, %v247_v1 }
  0xcd   :  { %v253_v5 = vsel %vm252_vm7, %v251_v2, %v250_v3 }
  0xce   :  { %v256_v7 = vsel %vm255_vm8, %v254_v4, %v253_v5 }
  0xcf   :  { %v259_v8 = vsel %vm258_vm9, %v257_v6, %v256_v7 }
  0xd0   :  { %383 = vmatmul.mubr.msk.f32.vlgmr.msra.gmra.mxu0 %vm133_vm2, %v259_v8 }
 0x190   :  { %v328_v10 = vpop.f32.mrf.mxu0 }
 0x191   :  { %v329_v11 = vadd.f32 %v367_v9, %v328_v10 }
 0x192   :  { %v384_v12 = vpop.f32.mrf.mxu0 }
 0x193   :  { %396 = vtanh.f32 %v329_v11 }
 0x1a0   :  { %v397_v13 = vpop.eup %396 }
 0x1a1   :  { %333 = vst.msk [vmem:[#allocation8] sm:$0xff] %vm133_vm2, %v397_v13  ;;  %v334_v14 = vpack.c.bf16 %v397_v13, %v397_v13 }
 0x1a2   :  { %469 = shalt.err (!%p466_p5)
}
 0x1a3   :  { %346 = dma.vmem_to_hbm [thread:$0]  %s344_s10, 128, %s577_s4, [#allocation4]   ;;  %336 = vst.msk [vmem:[#allocation9] sm:$0xf] %vm335_vm10, %v334_v14 }
 0x1a4   :  { %s478_s15 = scalar_lea.vmem %s354_s12, 64  ;;  %p483_p7 = scmp.lt.s32.totalorder %s354_s12, %s354_s12 }
 0x1a5   :  { %p479_p6 = scmp.ne.s32.totalorder %s354_s12, %s478_s15  ;;  %p484_p8 = scmp.lt.s32.totalorder %s478_s15, %s478_s15 }
 0x1a7   :  { %p485_p9 = por %p484_p8, %p483_p7 }
 0x1a9   :  { %p486_p10 = pnand %p485_p9, %p479_p6 }
 0x1ab   :  { %489 = shalt.err (!%p486_p10)
}
 0x1ac   :  { %356 = dma.vmem_to_hbm [thread:$0]  %s354_s12, 64, %s578_s5, [#allocation10]  }
 0x1ad   :  { %502 = dma.done.wait [#allocation4], 128  }
 0x1ae   :  { %503 = vsyncadd [#allocation4], 4294967168 }
 0x1af   :  { %504 = dma.done.wait [#allocation10], 64  }
 0x1b0   :  { %505 = vsyncadd [#allocation10], 4294967232 }
 0x1b1   :  { %363 = vsyncpa [#allocation3], 1 }
 0x1b2   :  { %364 = vsyncpa [#allocation6], 1 }
 0x1b3   :  { %365 = vsyncpa [#allocation4], 1 }
 0x1b4   :  { %366 = vsyncpa [#allocation10], 1 }

</bundles_post_ra>
